<compile_context>
chip_gen: v5e
topology: v5e:2x2
jax: 0.10.0
libtpu: 0.0.40
codegen_flags: <defaults>
</compile_context>

<pallas_src>
import jax
import jax.numpy as jnp
import numpy as np
from jax.experimental import pallas as pl
from jax.experimental.pallas import tpu as pltpu


# ---------------------------------------------------------------------------
# Kernels
# ---------------------------------------------------------------------------
def _phi_head_kernel(x_ref, w1_ref, b1_ref, v1_ref, v2_ref, c1_ref, c2_ref,
                     y1_ref, y2_ref):
    """One grid step = one block of TJ DAG nodes, head fused in.

    x_ref  : [n, d]           full input
    w1_ref : [m1, d, TJ]      masked fc1 weights for this node block
    b1_ref : [m1, 1, TJ]      fc1 biases for this node block
    v1_ref : [m1, n, 1]       (beta_w  @ W2)   transposed, per hidden unit
    v2_ref : [m1, n, 1]       (recon   @ W2)   transposed, per hidden unit
    c1_ref : [n, 1]           beta_w @ b2 + beta_b
    c2_ref : [n, 1]           recon  @ b2 + beta_b
    y1_ref : [n, TJ]          lane-dense output block
    y2_ref : [n, TJ]          lane-dense output block
    """
    f32 = jnp.float32
    x = x_ref[...]                                   # [n, d]
    n = x.shape[0]
    m1 = w1_ref.shape[0]
    tj = y1_ref.shape[1]

    acc1 = jnp.zeros((n, tj), f32)
    acc2 = jnp.zeros((n, tj), f32)
    # Static unroll over the (small) fc1 hidden width.  Each iteration is one
    # clean [n, d] @ [d, TJ] MXU matmul plus VPU sigmoid / FMA on [n, TJ].
    for m in range(m1):
        h = jnp.dot(x, w1_ref[m], preferred_element_type=f32) + b1_ref[m]
        s = jax.nn.sigmoid(h)                        # [n, TJ]
        acc1 = acc1 + s * v1_ref[m]                  # [n, 1] lane-broadcast
        acc2 = acc2 + s * v2_ref[m]
    y1_ref[...] = acc1 + c1_ref[...]
    y2_ref[...] = acc2 + c2_ref[...]


def _prep_kernel(beta_ref, bias_ref, eps_ref, w2km_ref, b2k_ref,
                 w1, b1, w2, b2, wmu, bmu, wlv, blv, w4, b4, w5, b5, w6, b6,
                 mu_ref, lv_ref, v1_ref, v2_ref, c1_ref, c2_ref):
    """VAE(beta) + pre-contraction of the fc2/beta head into v1/v2/c1/c2."""
    f32 = jnp.float32
    beta = beta_ref[...]                                                 # [n, K]
    h = jax.nn.relu(jnp.dot(beta, w1[...], preferred_element_type=f32) + b1[...])
    h = jax.nn.relu(jnp.dot(h, w2[...], preferred_element_type=f32) + b2[...])
    mu = jnp.dot(h, wmu[...], preferred_element_type=f32) + bmu[...]
    lv = jnp.dot(h, wlv[...], preferred_element_type=f32) + blv[...]
    z = mu + eps_ref[...] * jnp.exp(0.5 * lv)
    g = jax.nn.relu(jnp.dot(z, w4[...], preferred_element_type=f32) + b4[...])
    g = jax.nn.relu(jnp.dot(g, w5[...], preferred_element_type=f32) + b5[...])
    recon = jnp.dot(g, w6[...], preferred_element_type=f32) + b6[...]   # [n, K]

    w2km = w2km_ref[...]                                                # [K, m1]
    b2k = b2k_ref[...]                                                  # [K, 1]
    bias = bias_ref[...]                                                # [n, 1]
    mu_ref[...] = mu
    lv_ref[...] = lv
    v1_ref[...] = jnp.dot(beta, w2km, preferred_element_type=f32)       # [n, m1]
    v2_ref[...] = jnp.dot(recon, w2km, preferred_element_type=f32)      # [n, m1]
    c1_ref[...] = jnp.dot(beta, b2k, preferred_element_type=f32) + bias
    c2_ref[...] = jnp.dot(recon, b2k, preferred_element_type=f32) + bias


# ---------------------------------------------------------------------------
# Wrappers
# ---------------------------------------------------------------------------
_VMEM = pl.BlockSpec(memory_space=pltpu.MemorySpace.VMEM)


def prep_forward(beta_w, beta_b, eps, w2km, b2k, vae):
    n, _ = beta_w.shape
    latent = eps.shape[1]
    m1 = w2km.shape[1]
    return pl.pallas_call(
        _prep_kernel,
        out_shape=(jax.ShapeDtypeStruct((n, latent), jnp.float32),
                   jax.ShapeDtypeStruct((n, latent), jnp.float32),
                   jax.ShapeDtypeStruct((n, m1), jnp.float32),
                   jax.ShapeDtypeStruct((n, m1), jnp.float32),
                   jax.ShapeDtypeStruct((n, 1), jnp.float32),
                   jax.ShapeDtypeStruct((n, 1), jnp.float32)),
        in_specs=[_VMEM] * 19,
        out_specs=(_VMEM,) * 6,
    )(beta_w, beta_b, eps, w2km, b2k,
      vae["w1"], vae["b1"], vae["w2"], vae["b2"],
      vae["wmu"], vae["bmu"], vae["wlv"], vae["blv"],
      vae["w4"], vae["b4"], vae["w5"], vae["b5"], vae["w6"], vae["b6"])


def phi_head_forward(x, w1f, b1f, v1k, v2k, c1, c2):
    n, d = x.shape
    m1, _, d_pad = w1f.shape
    tj = d_pad if d_pad <= 256 else 256       # node block width (lane axis)
    assert d_pad % tj == 0
    grid = (d_pad // tj,)
    y1p, y2p = pl.pallas_call(
        _phi_head_kernel,
        out_shape=(jax.ShapeDtypeStruct((n, d_pad), jnp.float32),
                   jax.ShapeDtypeStruct((n, d_pad), jnp.float32)),
        grid_spec=pltpu.PrefetchScalarGridSpec(
            num_scalar_prefetch=0,
            grid=grid,
            in_specs=[
                pl.BlockSpec((n, d), lambda t: (0, 0)),          # x (resident)
                pl.BlockSpec((m1, d, tj), lambda t: (0, 0, t)),  # w1 block
                pl.BlockSpec((m1, 1, tj), lambda t: (0, 0, t)),  # b1 block
                pl.BlockSpec((m1, n, 1), lambda t: (0, 0, 0)),   # v1
                pl.BlockSpec((m1, n, 1), lambda t: (0, 0, 0)),   # v2
                pl.BlockSpec((n, 1), lambda t: (0, 0)),          # c1
                pl.BlockSpec((n, 1), lambda t: (0, 0)),          # c2
            ],
            out_specs=[pl.BlockSpec((n, tj), lambda t: (0, t)),
                       pl.BlockSpec((n, tj), lambda t: (0, t))],
        ),
        # Node-block axis is embarrassingly parallel -> megacore / v7x 2-TC.
        # For very large d, also raise vmem_limit_bytes here (w1 block is
        # m1*d*tj*4 bytes, double-buffered).
        compiler_params=pltpu.CompilerParams(
            dimension_semantics=("parallel",)),
    )(x, w1f, b1f, v1k, v2k, c1, c2)
    return y1p[:, :d], y2p[:, :d]


def scalable_dag_v3_forward(x, params, eps):
    """Returns (y1, y2, mu, logvar) matching the PyTorch module semantics."""
    mu, logvar, v1, v2, c1, c2 = prep_forward(
        params["beta_w"], params["beta_b"], eps,
        params["w2km"], params["b2k"], params["vae"])
    # Tiny (m1 x n, a few hundred bytes) layout glue so the phi kernel can
    # index the per-hidden-unit head vectors along a leading (untiled) axis.
    v1k = jnp.transpose(v1, (1, 0))[:, :, None]     # [m1, n, 1]
    v2k = jnp.transpose(v2, (1, 0))[:, :, None]     # [m1, n, 1]
    y1, y2 = phi_head_forward(x, params["w1f"], params["b1f"],
                              v1k, v2k, c1, c2)
    return y1, y2, mu, logvar


# ---------------------------------------------------------------------------
# Deterministic parameter init (shapes follow the torch module's __init__)
# ---------------------------------------------------------------------------
def init_params(key, d, dims, K, batch_size, pivae_dims):
    assert len(dims) == 3 and dims[0] == d and dims[-1] == 1
    m1 = dims[1]
    h1, h2, latent = pivae_dims
    keys = iter(jax.random.split(key, 24))

    def lin(k, fan_in, shape):
        b = 1.0 / np.sqrt(fan_in)
        return jax.random.uniform(k, shape, jnp.float32, -b, b)

    # d x Linear(d, m1) for fc1_pos / fc1_neg (torch weight shape [m1, d]).
    w1_pos = lin(next(keys), d, (d, m1, d))
    w1_neg = lin(next(keys), d, (d, m1, d))
    b1_pos = lin(next(keys), d, (d, m1))
    b1_neg = lin(next(keys), d, (d, m1))
    w1_nodes = w1_pos - w1_neg                      # [d_nodes, m1, d_in]
    b1_nodes = b1_pos - b1_neg                      # [d_nodes, m1]

    # ---- kernel layout ----------------------------------------------------
    # Zeroing column j of x == zeroing input column j of node j's weight, so
    # the mask is folded into the weights once here (no runtime masking).
    node_ids = jnp.arange(d)
    mask = (jnp.arange(d)[None, None, :] != node_ids[:, None, None])
    w1_masked = w1_nodes * mask                     # w1_masked[j, :, j] = 0
    w1f = jnp.transpose(w1_masked, (1, 2, 0))       # [m1, d_in, d_nodes]
    b1f = jnp.transpose(b1_nodes, (1, 0))[:, None, :]   # [m1, 1, d_nodes]

    # Pad the node axis to a multiple of the 256-wide node block for large d.
    d_pad = d if d <= 256 else int(np.ceil(d / 256.0) * 256)
    if d_pad != d:
        w1f = jnp.pad(w1f, ((0, 0), (0, 0), (0, d_pad - d)))
        b1f = jnp.pad(b1f, ((0, 0), (0, 0), (0, d_pad - d)))

    # fc2: LocallyConnected(K, m1, 1): weight [K, m1, 1], bias [K, 1]
    w2 = lin(next(keys), m1, (K, m1, 1))
    b2 = lin(next(keys), m1, (K, 1))
    w2km = w2[:, :, 0]                              # [K, m1]
    b2k = b2                                        # [K, 1]

    # batch_size x Linear(K, 1)
    beta_w = lin(next(keys), K, (batch_size, K))
    beta_b = lin(next(keys), K, (batch_size, 1))

    # VAE(K, h1, h2, latent) — weights stored input-major, biases as (1, out)
    vae = {
        "w1": jnp.transpose(lin(next(keys), K, (h1, K))),
        "b1": lin(next(keys), K, (1, h1)),
        "w2": jnp.transpose(lin(next(keys), h1, (h2, h1))),
        "b2": lin(next(keys), h1, (1, h2)),
        "wmu": jnp.transpose(lin(next(keys), h2, (latent, h2))),
        "bmu": lin(next(keys), h2, (1, latent)),
        "wlv": jnp.transpose(lin(next(keys), h2, (latent, h2))),
        "blv": lin(next(keys), h2, (1, latent)),
        "w4": jnp.transpose(lin(next(keys), latent, (h2, latent))),
        "b4": lin(next(keys), latent, (1, h2)),
        "w5": jnp.transpose(lin(next(keys), h2, (h1, h2))),
        "b5": lin(next(keys), h2, (1, h1)),
        "w6": jnp.transpose(lin(next(keys), h1, (K, h1))),
        "b6": lin(next(keys), h1, (1, K)),
    }
    return dict(w1f=w1f, b1f=b1f, w2km=w2km, b2k=b2k,
                beta_w=beta_w, beta_b=beta_b, vae=vae,
                # raw, UNMASKED per-node fc1 params for the reference check
                w1_nodes=w1_nodes, b1_nodes=b1_nodes)


# ---------------------------------------------------------------------------
# Pure-JAX reference replicating the original (per-node, x-column-zeroing,
# explicit phi tensor) semantics for a correctness check.
# ---------------------------------------------------------------------------
def reference_forward(x, params, eps):
    n, d = x.shape
    w2km, b2k = params["w2km"], params["b2k"]
    phis = []
    for j in range(d):
        xp = x.at[:, j].set(0.0)
        h = xp @ params["w1_nodes"][j].T + params["b1_nodes"][j]
        s = jax.nn.sigmoid(h)
        phis.append(s @ w2km.T + b2k[:, 0])
    phi = jnp.stack(phis, axis=1)                   # [n, d, K]
    beta = params["beta_w"]
    v = params["vae"]
    h = jax.nn.relu(beta @ v["w1"] + v["b1"])
    h = jax.nn.relu(h @ v["w2"] + v["b2"])
    mu = h @ v["wmu"] + v["bmu"]
    lv = h @ v["wlv"] + v["blv"]
    z = mu + eps * jnp.exp(0.5 * lv)
    g = jax.nn.relu(z @ v["w4"] + v["b4"])
    g = jax.nn.relu(g @ v["w5"] + v["b5"])
    recon = g @ v["w6"] + v["b6"]
    y1 = jnp.einsum("ndk,nk->nd", phi, beta) + params["beta_b"]
    y2 = jnp.einsum("ndk,nk->nd", phi, recon) + params["beta_b"]
    return y1, y2, mu, lv


# ---------------------------------------------------------------------------
if __name__ == "__main__":
    d = 8
    dims = [d, 16, 1]          # dims[0]=d, dims[-1]=1
    K = 4
    batch_size = 2             # forward requires x.shape[0] == batch_size
    pivae_dims = [32, 16, 8]

    key = jax.random.PRNGKey(0)
    kx, kp, ke = jax.random.split(key, 3)
    x = jax.random.normal(kx, (batch_size, d), jnp.float32)
    params = init_params(kp, d, dims, K, batch_size, pivae_dims)
    eps = jax.random.normal(ke, (batch_size, pivae_dims[2]), jnp.float32)

    out = scalable_dag_v3_forward(x, params, eps)
    out = jax.block_until_ready(out)

    ref = reference_forward(x, params, eps)
    for got, want in zip(out, ref):
        np.testing.assert_allclose(np.asarray(got), np.asarray(want),
                                   rtol=2e-3, atol=2e-3)

    print("KERNEL_OK")
</pallas_src>

<mosaic_0001>
module attributes {stable_mosaic.version = 11 : i64} {
  func.func @_prep_kernel(%arg0: memref<2x4xf32, #tpu.memory_space<vmem>>, %arg1: memref<2x1xf32, #tpu.memory_space<vmem>>, %arg2: memref<2x8xf32, #tpu.memory_space<vmem>>, %arg3: memref<4x16xf32, #tpu.memory_space<vmem>>, %arg4: memref<4x1xf32, #tpu.memory_space<vmem>>, %arg5: memref<4x32xf32, #tpu.memory_space<vmem>>, %arg6: memref<1x32xf32, #tpu.memory_space<vmem>>, %arg7: memref<32x16xf32, #tpu.memory_space<vmem>>, %arg8: memref<1x16xf32, #tpu.memory_space<vmem>>, %arg9: memref<16x8xf32, #tpu.memory_space<vmem>>, %arg10: memref<1x8xf32, #tpu.memory_space<vmem>>, %arg11: memref<16x8xf32, #tpu.memory_space<vmem>>, %arg12: memref<1x8xf32, #tpu.memory_space<vmem>>, %arg13: memref<8x16xf32, #tpu.memory_space<vmem>>, %arg14: memref<1x16xf32, #tpu.memory_space<vmem>>, %arg15: memref<16x32xf32, #tpu.memory_space<vmem>>, %arg16: memref<1x32xf32, #tpu.memory_space<vmem>>, %arg17: memref<32x4xf32, #tpu.memory_space<vmem>>, %arg18: memref<1x4xf32, #tpu.memory_space<vmem>>, %arg19: memref<2x8xf32, #tpu.memory_space<vmem>>, %arg20: memref<2x8xf32, #tpu.memory_space<vmem>>, %arg21: memref<2x16xf32, #tpu.memory_space<vmem>>, %arg22: memref<2x16xf32, #tpu.memory_space<vmem>>, %arg23: memref<2x1xf32, #tpu.memory_space<vmem>>, %arg24: memref<2x1xf32, #tpu.memory_space<vmem>>) attributes {dimension_semantics = [], scalar_prefetch = 0 : i64, scratch_operands = 0 : i64, tpu.core_type = #tpu.core_type<tc>} {
    %c0 = arith.constant 0 : index
    %c0_0 = arith.constant 0 : index
    %0 = vector.load %arg0[%c0, %c0_0] : memref<2x4xf32, #tpu.memory_space<vmem>>, vector<2x4xf32>
    %c0_1 = arith.constant 0 : index
    %c0_2 = arith.constant 0 : index
    %1 = vector.load %arg5[%c0_1, %c0_2] : memref<4x32xf32, #tpu.memory_space<vmem>>, vector<4x32xf32>
    %cst = arith.constant dense<0.000000e+00> : vector<2x32xf32>
    %2 = tpu.matmul %0, %1, %cst {dimension_numbers = #tpu.dot_dimension_numbers<[1], [0], [0], [1], [0, 0, 1, 1], [], []>} : vector<2x4xf32>, vector<4x32xf32>, vector<2x32xf32> -> vector<2x32xf32>
    %c0_3 = arith.constant 0 : index
    %c0_4 = arith.constant 0 : index
    %3 = vector.load %arg6[%c0_3, %c0_4] : memref<1x32xf32, #tpu.memory_space<vmem>>, vector<1x32xf32>
    %4 = vector.broadcast %3 : vector<1x32xf32> to vector<2x32xf32>
    %5 = arith.addf %2, %4 : vector<2x32xf32>
    %cst_5 = arith.constant 0.000000e+00 : f32
    %6 = vector.broadcast %cst_5 : f32 to vector<2x32xf32>
    %7 = arith.maximumf %5, %6 : vector<2x32xf32>
    %c0_6 = arith.constant 0 : index
    %c0_7 = arith.constant 0 : index
    %8 = vector.load %arg7[%c0_6, %c0_7] : memref<32x16xf32, #tpu.memory_space<vmem>>, vector<32x16xf32>
    %cst_8 = arith.constant dense<0.000000e+00> : vector<2x16xf32>
    %9 = tpu.matmul %7, %8, %cst_8 {dimension_numbers = #tpu.dot_dimension_numbers<[1], [0], [0], [1], [0, 0, 1, 1], [], []>} : vector<2x32xf32>, vector<32x16xf32>, vector<2x16xf32> -> vector<2x16xf32>
    %c0_9 = arith.constant 0 : index
    %c0_10 = arith.constant 0 : index
    %10 = vector.load %arg8[%c0_9, %c0_10] : memref<1x16xf32, #tpu.memory_space<vmem>>, vector<1x16xf32>
    %11 = vector.broadcast %10 : vector<1x16xf32> to vector<2x16xf32>
    %12 = arith.addf %9, %11 : vector<2x16xf32>
    %cst_11 = arith.constant 0.000000e+00 : f32
    %13 = vector.broadcast %cst_11 : f32 to vector<2x16xf32>
    %14 = arith.maximumf %12, %13 : vector<2x16xf32>
    %c0_12 = arith.constant 0 : index
    %c0_13 = arith.constant 0 : index
    %15 = vector.load %arg9[%c0_12, %c0_13] : memref<16x8xf32, #tpu.memory_space<vmem>>, vector<16x8xf32>
    %cst_14 = arith.constant dense<0.000000e+00> : vector<2x8xf32>
    %16 = tpu.matmul %14, %15, %cst_14 {dimension_numbers = #tpu.dot_dimension_numbers<[1], [0], [0], [1], [0, 0, 1, 1], [], []>} : vector<2x16xf32>, vector<16x8xf32>, vector<2x8xf32> -> vector<2x8xf32>
    %c0_15 = arith.constant 0 : index
    %c0_16 = arith.constant 0 : index
    %17 = vector.load %arg10[%c0_15, %c0_16] : memref<1x8xf32, #tpu.memory_space<vmem>>, vector<1x8xf32>
    %18 = vector.broadcast %17 : vector<1x8xf32> to vector<2x8xf32>
    %19 = arith.addf %16, %18 : vector<2x8xf32>
    %c0_17 = arith.constant 0 : index
    %c0_18 = arith.constant 0 : index
    %20 = vector.load %arg11[%c0_17, %c0_18] : memref<16x8xf32, #tpu.memory_space<vmem>>, vector<16x8xf32>
    %cst_19 = arith.constant dense<0.000000e+00> : vector<2x8xf32>
    %21 = tpu.matmul %14, %20, %cst_19 {dimension_numbers = #tpu.dot_dimension_numbers<[1], [0], [0], [1], [0, 0, 1, 1], [], []>} : vector<2x16xf32>, vector<16x8xf32>, vector<2x8xf32> -> vector<2x8xf32>
    %c0_20 = arith.constant 0 : index
    %c0_21 = arith.constant 0 : index
    %22 = vector.load %arg12[%c0_20, %c0_21] : memref<1x8xf32, #tpu.memory_space<vmem>>, vector<1x8xf32>
    %23 = vector.broadcast %22 : vector<1x8xf32> to vector<2x8xf32>
    %24 = arith.addf %21, %23 : vector<2x8xf32>
    %c0_22 = arith.constant 0 : index
    %c0_23 = arith.constant 0 : index
    %25 = vector.load %arg2[%c0_22, %c0_23] : memref<2x8xf32, #tpu.memory_space<vmem>>, vector<2x8xf32>
    %cst_24 = arith.constant 5.000000e-01 : f32
    %26 = vector.broadcast %cst_24 : f32 to vector<2x8xf32>
    %27 = arith.mulf %26, %24 : vector<2x8xf32>
    %28 = math.exp %27 : vector<2x8xf32>
    %29 = arith.mulf %25, %28 : vector<2x8xf32>
    %30 = arith.addf %19, %29 : vector<2x8xf32>
    %c0_25 = arith.constant 0 : index
    %c0_26 = arith.constant 0 : index
    %31 = vector.load %arg13[%c0_25, %c0_26] : memref<8x16xf32, #tpu.memory_space<vmem>>, vector<8x16xf32>
    %cst_27 = arith.constant dense<0.000000e+00> : vector<2x16xf32>
    %32 = tpu.matmul %30, %31, %cst_27 {dimension_numbers = #tpu.dot_dimension_numbers<[1], [0], [0], [1], [0, 0, 1, 1], [], []>} : vector<2x8xf32>, vector<8x16xf32>, vector<2x16xf32> -> vector<2x16xf32>
    %c0_28 = arith.constant 0 : index
    %c0_29 = arith.constant 0 : index
    %33 = vector.load %arg14[%c0_28, %c0_29] : memref<1x16xf32, #tpu.memory_space<vmem>>, vector<1x16xf32>
    %34 = vector.broadcast %33 : vector<1x16xf32> to vector<2x16xf32>
    %35 = arith.addf %32, %34 : vector<2x16xf32>
    %cst_30 = arith.constant 0.000000e+00 : f32
    %36 = vector.broadcast %cst_30 : f32 to vector<2x16xf32>
    %37 = arith.maximumf %35, %36 : vector<2x16xf32>
    %c0_31 = arith.constant 0 : index
    %c0_32 = arith.constant 0 : index
    %38 = vector.load %arg15[%c0_31, %c0_32] : memref<16x32xf32, #tpu.memory_space<vmem>>, vector<16x32xf32>
    %cst_33 = arith.constant dense<0.000000e+00> : vector<2x32xf32>
    %39 = tpu.matmul %37, %38, %cst_33 {dimension_numbers = #tpu.dot_dimension_numbers<[1], [0], [0], [1], [0, 0, 1, 1], [], []>} : vector<2x16xf32>, vector<16x32xf32>, vector<2x32xf32> -> vector<2x32xf32>
    %c0_34 = arith.constant 0 : index
    %c0_35 = arith.constant 0 : index
    %40 = vector.load %arg16[%c0_34, %c0_35] : memref<1x32xf32, #tpu.memory_space<vmem>>, vector<1x32xf32>
    %41 = vector.broadcast %40 : vector<1x32xf32> to vector<2x32xf32>
    %42 = arith.addf %39, %41 : vector<2x32xf32>
    %cst_36 = arith.constant 0.000000e+00 : f32
    %43 = vector.broadcast %cst_36 : f32 to vector<2x32xf32>
    %44 = arith.maximumf %42, %43 : vector<2x32xf32>
    %c0_37 = arith.constant 0 : index
    %c0_38 = arith.constant 0 : index
    %45 = vector.load %arg17[%c0_37, %c0_38] : memref<32x4xf32, #tpu.memory_space<vmem>>, vector<32x4xf32>
    %cst_39 = arith.constant dense<0.000000e+00> : vector<2x4xf32>
    %46 = tpu.matmul %44, %45, %cst_39 {dimension_numbers = #tpu.dot_dimension_numbers<[1], [0], [0], [1], [0, 0, 1, 1], [], []>} : vector<2x32xf32>, vector<32x4xf32>, vector<2x4xf32> -> vector<2x4xf32>
    %c0_40 = arith.constant 0 : index
    %c0_41 = arith.constant 0 : index
    %47 = vector.load %arg18[%c0_40, %c0_41] : memref<1x4xf32, #tpu.memory_space<vmem>>, vector<1x4xf32>
    %48 = vector.broadcast %47 : vector<1x4xf32> to vector<2x4xf32>
    %49 = arith.addf %46, %48 : vector<2x4xf32>
    %c0_42 = arith.constant 0 : index
    %c0_43 = arith.constant 0 : index
    %50 = vector.load %arg3[%c0_42, %c0_43] : memref<4x16xf32, #tpu.memory_space<vmem>>, vector<4x16xf32>
    %c0_44 = arith.constant 0 : index
    %c0_45 = arith.constant 0 : index
    %51 = vector.load %arg4[%c0_44, %c0_45] : memref<4x1xf32, #tpu.memory_space<vmem>>, vector<4x1xf32>
    %c0_46 = arith.constant 0 : index
    %c0_47 = arith.constant 0 : index
    %52 = vector.load %arg1[%c0_46, %c0_47] : memref<2x1xf32, #tpu.memory_space<vmem>>, vector<2x1xf32>
    %c0_48 = arith.constant 0 : index
    %c0_49 = arith.constant 0 : index
    %53 = vector.load %arg19[%c0_48, %c0_49] : memref<2x8xf32, #tpu.memory_space<vmem>>, vector<2x8xf32>
    tpu.vector_store %arg19[%c0_48, %c0_49], %19 {strides = array<i32>} : memref<2x8xf32, #tpu.memory_space<vmem>>, vector<2x8xf32>,
    %c0_50 = arith.constant 0 : index
    %c0_51 = arith.constant 0 : index
    %54 = vector.load %arg20[%c0_50, %c0_51] : memref<2x8xf32, #tpu.memory_space<vmem>>, vector<2x8xf32>
    tpu.vector_store %arg20[%c0_50, %c0_51], %24 {strides = array<i32>} : memref<2x8xf32, #tpu.memory_space<vmem>>, vector<2x8xf32>,
    %cst_52 = arith.constant dense<0.000000e+00> : vector<2x16xf32>
    %55 = tpu.matmul %0, %50, %cst_52 {dimension_numbers = #tpu.dot_dimension_numbers<[1], [0], [0], [1], [0, 0, 1, 1], [], []>} : vector<2x4xf32>, vector<4x16xf32>, vector<2x16xf32> -> vector<2x16xf32>
    %c0_53 = arith.constant 0 : index
    %c0_54 = arith.constant 0 : index
    %56 = vector.load %arg21[%c0_53, %c0_54] : memref<2x16xf32, #tpu.memory_space<vmem>>, vector<2x16xf32>
    tpu.vector_store %arg21[%c0_53, %c0_54], %55 {strides = array<i32>} : memref<2x16xf32, #tpu.memory_space<vmem>>, vector<2x16xf32>,
    %cst_55 = arith.constant dense<0.000000e+00> : vector<2x16xf32>
    %57 = tpu.matmul %49, %50, %cst_55 {dimension_numbers = #tpu.dot_dimension_numbers<[1], [0], [0], [1], [0, 0, 1, 1], [], []>} : vector<2x4xf32>, vector<4x16xf32>, vector<2x16xf32> -> vector<2x16xf32>
    %c0_56 = arith.constant 0 : index
    %c0_57 = arith.constant 0 : index
    %58 = vector.load %arg22[%c0_56, %c0_57] : memref<2x16xf32, #tpu.memory_space<vmem>>, vector<2x16xf32>
    tpu.vector_store %arg22[%c0_56, %c0_57], %57 {strides = array<i32>} : memref<2x16xf32, #tpu.memory_space<vmem>>, vector<2x16xf32>,
    %cst_58 = arith.constant dense<0.000000e+00> : vector<2x1xf32>
    %59 = tpu.matmul %0, %51, %cst_58 {dimension_numbers = #tpu.dot_dimension_numbers<[1], [0], [0], [1], [0, 0, 1, 1], [], []>} : vector<2x4xf32>, vector<4x1xf32>, vector<2x1xf32> -> vector<2x1xf32>
    %60 = arith.addf %59, %52 : vector<2x1xf32>
    %c0_59 = arith.constant 0 : index
    %c0_60 = arith.constant 0 : index
    %61 = vector.load %arg23[%c0_59, %c0_60] : memref<2x1xf32, #tpu.memory_space<vmem>>, vector<2x1xf32>
    tpu.vector_store %arg23[%c0_59, %c0_60], %60 {strides = array<i32>} : memref<2x1xf32, #tpu.memory_space<vmem>>, vector<2x1xf32>,
    %cst_61 = arith.constant dense<0.000000e+00> : vector<2x1xf32>
    %62 = tpu.matmul %49, %51, %cst_61 {dimension_numbers = #tpu.dot_dimension_numbers<[1], [0], [0], [1], [0, 0, 1, 1], [], []>} : vector<2x4xf32>, vector<4x1xf32>, vector<2x1xf32> -> vector<2x1xf32>
    %63 = arith.addf %62, %52 : vector<2x1xf32>
    %c0_62 = arith.constant 0 : index
    %c0_63 = arith.constant 0 : index
    %64 = vector.load %arg24[%c0_62, %c0_63] : memref<2x1xf32, #tpu.memory_space<vmem>>, vector<2x1xf32>
    tpu.vector_store %arg24[%c0_62, %c0_63], %63 {strides = array<i32>} : memref<2x1xf32, #tpu.memory_space<vmem>>, vector<2x1xf32>,
    return
  }
}

</mosaic_0001>

<bundles_post_ra>
// kernel: tpu_custom_call.1
= control target key start
LH: loop header
LB: loop body
LE: loop exit
PB: predicated region body
PF: predicated region fallthrough
CT: control target
= control target key end

     0   :  { %s848_s0 = inlined_call_operand.vmem [shape: f32[2,4], index: 0, kind: input, shape index: {}]   ;;  %s849_s1 = inlined_call_operand.vmem [shape: f32[2,1], index: 1, kind: input, shape index: {}]   ;;  %s850_s2 = inlined_call_operand.vmem [shape: f32[2,8], index: 2, kind: input, shape index: {}]   ;;  %s851_s3 = inlined_call_operand.vmem [shape: f32[4,16], index: 3, kind: input, shape index: {}]   ;;  %s852_s4 = inlined_call_operand.vmem [shape: f32[4,1], index: 4, kind: input, shape index: {}]   ;;  %s853_s5 = inlined_call_operand.vmem [shape: f32[4,32], index: 5, kind: input, shape index: {}]   ;;  %s854_s6 = inlined_call_operand.vmem [shape: f32[1,32], index: 6, kind: input, shape index: {}]   ;;  %s855_s7 = inlined_call_operand.vmem [shape: f32[32,16], index: 7, kind: input, shape index: {}]   ;;  %s856_s8 = inlined_call_operand.vmem [shape: f32[1,16], index: 8, kind: input, shape index: {}]   ;;  %s857_s9 = inlined_call_operand.vmem [shape: f32[16,8], index: 9, kind: input, shape index: {}]   ;;  %s858_s10 = inlined_call_operand.vmem [shape: f32[1,8], index: 10, kind: input, shape index: {}]   ;;  %s859_s11 = inlined_call_operand.vmem [shape: f32[16,8], index: 11, kind: input, shape index: {}]   ;;  %s860_s12 = inlined_call_operand.vmem [shape: f32[1,8], index: 12, kind: input, shape index: {}]   ;;  %s861_s13 = inlined_call_operand.vmem [shape: f32[8,16], index: 13, kind: input, shape index: {}]   ;;  %s862_s14 = inlined_call_operand.vmem [shape: f32[1,16], index: 14, kind: input, shape index: {}]   ;;  %s863_s15 = inlined_call_operand.vmem [shape: f32[16,32], index: 15, kind: input, shape index: {}]   ;;  %s864_s16 = inlined_call_operand.vmem [shape: f32[1,32], index: 16, kind: input, shape index: {}]   ;;  %s865_s17 = inlined_call_operand.vmem [shape: f32[32,4], index: 17, kind: input, shape index: {}]   ;;  %s866_s18 = inlined_call_operand.vmem [shape: f32[1,4], index: 18, kind: input, shape index: {}]   ;;  %s867_s19 = inlined_call_operand.hbm [shape: f32[2,8], index: 19, kind: output, shape index: {0}]   ;;  %s868_s20 = inlined_call_operand.hbm [shape: f32[2,8], index: 20, kind: output, shape index: {1}]   ;;  %s869_s21 = inlined_call_operand.hbm [shape: f32[2,16], index: 21, kind: output, shape index: {2}]   ;;  %s870_s22 = inlined_call_operand.hbm [shape: f32[2,16], index: 22, kind: output, shape index: {3}]   ;;  %s871_s23 = inlined_call_operand.vmem [shape: f32[2,1], index: 23, kind: output, shape index: {4}]   ;;  %s872_s24 = inlined_call_operand.vmem [shape: f32[2,1], index: 24, kind: output, shape index: {5}]  }
   0x1   :  { %874 = sst [smem:[#allocation12_spill]] %s848_s0 }
   0x2   :  { %875 = sst [smem:[#allocation13_spill]] %s849_s1 }
   0x3   :  { %876 = sst [smem:[#allocation14_spill]] %s850_s2 }
   0x4   :  { %877 = sst [smem:[#allocation15_spill]] %s851_s3 }
   0x5   :  { %878 = sst [smem:[#allocation16_spill]] %s852_s4 }
   0x6   :  { %879 = sst [smem:[#allocation17_spill]] %s853_s5 }
   0x7   :  { %880 = sst [smem:[#allocation18_spill]] %s854_s6 }
   0x8   :  { %881 = sst [smem:[#allocation19_spill]] %s855_s7 }
   0x9   :  { %882 = sst [smem:[#allocation20_spill]] %s856_s8 }
   0xa   :  { %30 = vsyncpa [#allocation3], 0 }
   0xb   :  { %31 = vsyncpa [#allocation5], 0  ;;  %s883_s27 = sld [smem:[#allocation17_spill]]  ;;  %vm81_vm0 = vcmask 1043456   ;;  %vm77_vm1 = vcmask 31744  }
   0xc   :  { %s884_s2 = sld [smem:[#allocation12_spill]] }
   0xd   :  { %s885_s7 = sld [smem:[#allocation19_spill]] }
  0x11   :  { %v72_v0 = vld [vmem:[%s883_s27] sm:$0xf] }
  0x12   :  { %v730_v1 = vld [vmem:[%s884_s2] sm:$0x3]  ;;  %464 = vmatpush.msk.msra.mxu0 %vm81_vm0, %v72_v0 }
  0x13   :  { %v109_v2 = vld [vmem:[%s885_s7 + $0x18] sm:$0xff]  ;;  %465 = vmatmul.msk.f32.vlgmr.msra.gmra.mxu0 %vm77_vm1, %v730_v1 }
  0x14   :  { %130 = vmatpush.msra.mxu1 %v109_v2 }
  0x15   :  { %32 = vsyncpa [#allocation8], 0  ;;  %v108_v3 = vld [vmem:[%s885_s7 + $0x10] sm:$0xff]  ;;  %v107_v4 = vld [vmem:[%s885_s7 + $0x8] sm:$0xff]  ;;  %s886_s27 = sld [smem:[#allocation18_spill]]  ;;  %vm114_vm2 = vcmask 261120  }
  0x16   :  { %131 = vmatpush.msra.mxu1 %v108_v3  ;;  %v106_v5 = vld [vmem:[%s885_s7] sm:$0xff]  ;;  %v140_v10 = vld [vmem:[%s857_s9 + $0x8] sm:$0xff]  ;;  %s887_s4 = sld [smem:[#allocation20_spill]]  ;;  %vm145_vm3 = vcmask 130048   ;;  %vm295_vm4 = vcmask 58368   ;;  %vm206_vm5 = vcmask 64512  }
  0x17   :  { %v170_v11 = vld [vmem:[%s859_s11 + $0x8] sm:$0xff]  ;;  %163 = vmatpush.msra.mxu2 %v140_v10  ;;  %v139_v12 = vld [vmem:[%s857_s9] sm:$0xff]  ;;  %s888_s29 = sld [smem:[#allocation14_spill]]  ;;  %v264_v33 = vld [vmem:[%s865_s17 + $0x18] sm:$0xff]  ;;  %s411_s0 = sshll.u32 %s868_s20, 4  ;;  %vm370_vm6 = vcmask 1024   ;;  %s412_s0 = int_to_ptr.hbm [resolvable:$true] %s411_s0 }
  0x18   :  { %132 = vmatpush.msra.mxu1 %v107_v4  ;;  %189 = vmatpush.msra.mxu3 %v170_v11  ;;  %v169_v13 = vld [vmem:[%s859_s11] sm:$0xff]  ;;  %v232_v19 = vld [vmem:[%s863_s15 + $0x8] sm:$0xff]  ;;  %v263_v34 = vld [vmem:[%s865_s17 + $0x10] sm:$0xff]  ;;  %s889_s26 = sld [smem:[#allocation16_spill]]  ;;  %s400_s3 = sshll.u32 %s867_s19, 4  ;;  %vm321_vm7 = vcmask 123904   ;;  %s401_s3 = int_to_ptr.hbm [resolvable:$true] %s400_s3 }
  0x19   :  { %164 = vmatpush.msra.mxu2 %v139_v12  ;;  %v201_v18 = vld [vmem:[%s861_s13] sm:$0xff]  ;;  %v262_v39 = vld [vmem:[%s865_s17 + $0x8] sm:$0xff]  ;;  %s890_s6 = sld [smem:[#allocation15_spill]]  ;;  %s597_s20 = smov [#allocation6]  }
  0x1a   :  { %133 = vmatpush.msra.mxu1 %v106_v5  ;;  %190 = vmatpush.msra.mxu3 %v169_v13  ;;  %v486_v20 = vld [vmem:[%s858_s10] ss:$0 sm:$0xff]  ;;  %s420_s1 = sshll.u32 %s597_s20, 4  ;;  %s422_s5 = sshll.u32 %s869_s21, 4  ;;  %s421_s1 = int_to_ptr.vmem [resolvable:$true] %s420_s1  ;;  %s423_s5 = int_to_ptr.hbm [resolvable:$true] %s422_s5 }
  0x1b   :  { %v484_v6 = vld [vmem:[%s886_s27] ss:$0 sm:$0xff]  ;;  %225 = vmatpush.msrb.mxu0 %v201_v18  ;;  %254 = vmatpush.msrb.mxu2 %v232_v19 }
  0x1c   :  { %v485_v14 = vld [vmem:[%s887_s4] ss:$0 sm:$0xff]  ;;  %284 = vmatpush.msrb.mxu3 %v264_v33  ;;  %s891_s4 = sld [smem:[#allocation13_spill]] }
  0x1d   :  { %v487_v21 = vld [vmem:[%s860_s12] ss:$0 sm:$0xff] }
  0x1e   :  { %v195_v28 = vld [vmem:[%s888_s29] sm:$0x3]  ;;  %285 = vmatpush.msrb.mxu3 %v263_v34 }
  0x1f   :  { %v231_v32 = vld [vmem:[%s863_s15] sm:$0xff] }
  0x20   :  { %255 = vmatpush.msrb.mxu2 %v231_v32  ;;  %v488_v35 = vld [vmem:[%s862_s14] ss:$0 sm:$0xff]  ;;  %286 = vmatpush.msrb.mxu3 %v262_v39  ;;  %s598_s14 = smov [#allocation7]  }
  0x21   :  { %v261_v40 = vld [vmem:[%s865_s17] sm:$0xff]  ;;  %s431_s27 = sshll.u32 %s598_s14, 4  ;;  %s432_s27 = int_to_ptr.vmem [resolvable:$true] %s431_s27 }
  0x22   :  { %287 = vmatpush.msrb.mxu3 %v261_v40  ;;  %v293_v41 = vld [vmem:[%s889_s26] sm:$0xf] }
  0x23   :  { %v489_v42 = vld [vmem:[%s864_s16] ss:$0 sm:$0xff]  ;;  %s595_s16 = smov [#allocation4]  }
  0x24   :  { %v292_v46 = vld [vmem:[%s890_s6] sm:$0xf]  ;;  %s409_s29 = sshll.u32 %s595_s16, 4  ;;  %s433_s6 = sshll.u32 %s870_s22, 4  ;;  %s410_s29 = int_to_ptr.vmem [resolvable:$true] %s409_s29  ;;  %s434_s6 = int_to_ptr.hbm [resolvable:$true] %s433_s6 }
  0x25   :  { %472 = vmatpush.msk.msrb.mxu1 %vm81_vm0, %v292_v46  ;;  %474 = vmatpush.msk.msra.mxu0 %vm81_vm0, %v292_v46  ;;  %v490_v47 = vld [vmem:[%s866_s18] ss:$0 sm:$0xff]  ;;  %s596_s18 = smov [#allocation2]  }
  0x26   :  { %s398_s25 = sshll.u32 %s596_s18, 4  ;;  %v294_v50 = vld [vmem:[%s891_s4] sm:$0x3]  ;;  %s399_s25 = int_to_ptr.vmem [resolvable:$true] %s398_s25 }
  0x90   :  { %v102_v7 = vpop.f32.mrf.mxu0 }
  0x91   :  { %v103_v8 = vadd.f32 %v484_v6, %v102_v7 }
  0x93   :  { %v105_v9 = vmax.f32 %v103_v8, 0.0 }
  0x95   :  { %466 = vmatmul.msk.f32.vlgmr.msra.gmra.mxu1 %vm114_vm2, %v105_v9 }
  0x9d   :  { %473 = vmatmul.msk.f32.vlgmr.msrb.gmra.mxu1 %vm77_vm1, %v730_v1 }
 0x112   :  { %v135_v15 = vpop.f32.mrf.mxu1 }
 0x113   :  { %v136_v16 = vadd.f32 %v485_v14, %v135_v15 }
 0x115   :  { %v138_v17 = vmax.f32 %v136_v16, 0.0 }
 0x117   :  { %467 = vmatmul.msk.f32.vlgmr.msra.gmra.mxu2 %vm145_vm3, %v138_v17  ;;  %468 = vmatmul.msk.f32.vlgmr.msra.gmra.mxu3 %vm145_vm3, %v138_v17 }
 0x118   :  { %476 = vmatpush.msk.msra.mxu2 %vm81_vm0, %v293_v41  ;;  %478 = vmatpush.msk.msra.mxu3 %vm81_vm0, %v293_v41 }
 0x11a   :  { %v318_v53 = vpop.f32.mrf.mxu1 }
 0x11b   :  { %322 = vst.msk [vmem:[#allocation6] sm:$0x3] %vm321_vm7, %v318_v53 }
 0x19a   :  { %v166_v22 = vpop.f32.mrf.mxu2  ;;  %v192_v23 = vpop.f32.mrf.mxu3 }
 0x19b   :  { %v167_v24 = vadd.f32 %v486_v20, %v166_v22  ;;  %v193_v25 = vadd.f32 %v487_v21, %v192_v23 }
 0x19d   :  { %v196_v26 = vmul.f32 0.5, %v193_v25  ;;  %297 = vst.msk [vmem:[#allocation4] sm:$0x3] %vm295_vm4, %v193_v25 }
 0x19e   :  { %296 = vst.msk [vmem:[#allocation2] sm:$0x3] %vm295_vm4, %v167_v24  ;;  %414 = dma.vmem_to_hbm [thread:$0]  %s410_s29, 32, %s412_s0, [#allocation5]  }
 0x19f   :  { %v197_v27 = vmul.f32 1.442695, %v196_v26  ;;  %403 = dma.vmem_to_hbm [thread:$0]  %s399_s25, 32, %s401_s3, [#allocation3]  }
 0x1a0   :  { %425 = dma.vmem_to_hbm [thread:$0]  %s421_s1, 32, %s423_s5, [#allocation5]  }
 0x1a1   :  { %491 = vpow2.f32 %v197_v27 }
 0x1a7   :  { %v492_v29 = vpop.eup %491 }
 0x1a8   :  { %v199_v30 = vmul.f32 %v492_v29, %v195_v28 }
 0x1aa   :  { %v200_v31 = vadd.f32 %v199_v30, %v167_v24 }
 0x1ac   :  { %469 = vmatmul.msk.f32.vlgmr.msrb.gmra.mxu0 %vm206_vm5, %v200_v31 }
 0x229   :  { %v227_v36 = vpop.f32.mrf.mxu0 }
 0x22a   :  { %v228_v37 = vadd.f32 %v488_v35, %v227_v36 }
 0x22c   :  { %v230_v38 = vmax.f32 %v228_v37, 0.0 }
 0x22e   :  { %470 = vmatmul.msk.f32.vlgmr.msrb.gmra.mxu2 %vm145_vm3, %v230_v38 }
 0x236   :  { %477 = vmatmul.msk.f32.vlgmr.msra.gmra.mxu2 %vm77_vm1, %v730_v1 }
 0x2b1   :  { %v257_v43 = vpop.f32.mrf.mxu2 }
 0x2b2   :  { %v258_v44 = vadd.f32 %v489_v42, %v257_v43 }
 0x2b4   :  { %v260_v45 = vmax.f32 %v258_v44, 0.0 }
 0x2b6   :  { %471 = vmatmul.msk.f32.vlgmr.msrb.gmra.mxu3 %vm114_vm2, %v260_v45 }
 0x2b9   :  { %v367_v51 = vpop.f32.mrf.mxu2 }
 0x2ba   :  { %v368_v52 = vadd.f32 %v367_v51, %v294_v50 }
 0x2bc   :  { %371 = vst.msk [vmem:[%s871_s23] sm:$0x3] %vm370_vm6, %v368_v52 }
 0x339   :  { %v289_v48 = vpop.f32.mrf.mxu3 }
 0x33a   :  { %v290_v49 = vadd.f32 %v490_v47, %v289_v48 }
 0x33c   :  { %475 = vmatmul.msk.f32.vlgmr.msra.gmra.mxu0 %vm77_vm1, %v290_v49  ;;  %479 = vmatmul.msk.f32.vlgmr.msra.gmra.mxu3 %vm77_vm1, %v290_v49 }
 0x3b9   :  { %v343_v54 = vpop.f32.mrf.mxu0 }
 0x3ba   :  { %346 = vst.msk [vmem:[#allocation7] sm:$0x3] %vm321_vm7, %v343_v54 }
 0x3bb   :  { %436 = dma.vmem_to_hbm [thread:$0]  %s432_s27, 32, %s434_s6, [#allocation8]  }
 0x3bf   :  { %v389_v55 = vpop.f32.mrf.mxu3 }
 0x3c0   :  { %v390_v56 = vadd.f32 %v389_v55, %v294_v50 }
 0x3c2   :  { %392 = vst.msk [vmem:[%s872_s24] sm:$0x3] %vm370_vm6, %v390_v56 }
 0x3c3   :  { %589 = dma.done.wait [#allocation3], 32  }
 0x3c4   :  { %590 = vsyncadd [#allocation3], 4294967264 }
 0x3c5   :  { %591 = dma.done.wait [#allocation5], 64  }
 0x3c6   :  { %592 = vsyncadd [#allocation5], 4294967232 }
 0x3c7   :  { %593 = dma.done.wait [#allocation8], 32  }
 0x3c8   :  { %594 = vsyncadd [#allocation8], 4294967264 }
 0x3c9   :  { %461 = vsyncpa [#allocation3], 1 }
 0x3ca   :  { %462 = vsyncpa [#allocation5], 1 }
 0x3cb   :  { %463 = vsyncpa [#allocation8], 1 }

</bundles_post_ra>
